<compile_context>
chip_gen: v6e
topology: v6e:2x2x1
jax: 0.10.0
libtpu: 0.0.40
codegen_flags: <defaults>
</compile_context>

<pallas_src>
import functools

import jax
import jax.numpy as jnp
from jax.experimental import pallas as pl
from jax.experimental.pallas import tpu as pltpu

_BN_EPS = 1e-5
_COMPUTE_DTYPE = jnp.bfloat16   # MXU-native on v6e/v7x; accumulation stays f32.


def _round_up(x, m):
    return ((x + m - 1) // m) * m


def _pick_row_tile(h):
    for th in (8, 4, 2, 1):
        if h % th == 0:
            return th
    return h


# ---------------------------------------------------------------------------
# Pallas kernels
# ---------------------------------------------------------------------------
def _matmul_bias_kernel(x_ref, w_ref, bias_ref, o_ref, *, relu):
    """(tm, Cin) @ (Cin, Cout) + per-channel bias (+ optional ReLU).

    BN scale (and any conv bias) is folded into w / bias at trace time, so the
    epilogue is a single add.
    """
    y = jnp.dot(x_ref[...], w_ref[...], preferred_element_type=jnp.float32)
    y = y + bias_ref[...]
    if relu:
        y = jnp.maximum(y, 0.0)
    o_ref[...] = y.astype(o_ref.dtype)


def _accum_conv3x3(x_ref, w_ref, r0, th, wd, acc):
    """Accumulate a 3x3 conv (pad=1, stride=1) over a tile of `th` output rows.

    x_ref : (1, H+2, W+2, Cin) padded input (one batch element)
    w_ref : (3, 3, Cin, Cout)  (BN scale already folded in)
    acc   : (th, W, Cout) f32 accumulator
    """
    rows = x_ref[0, pl.ds(r0, th + 2), :, :]          # (th+2, W+2, Cin)
    # kw (sublane shift -> relayout copy) outermost: only 3 shifted copies per
    # tile; kh slices the leading (free) axis.
    for kw in range(3):
        xs = rows[:, kw:kw + wd, :]                   # (th+2, W, Cin)
        for kh in range(3):
            acc = acc + jnp.dot(xs[kh:kh + th], w_ref[kh, kw],
                                preferred_element_type=jnp.float32)
    return acc


def _conv3x3_dual_kernel(xa_ref, xb_ref, wa_ref, wb_ref, bias_ref, o_ref, *, th):
    """3x3 conv over two concatenated-channel inputs (concat fused away) + BN + ReLU."""
    r0 = pl.multiple_of(pl.program_id(1) * th, th)
    wd = o_ref.shape[2]
    cout = o_ref.shape[3]
    acc = jnp.zeros((th, wd, cout), jnp.float32)
    acc = _accum_conv3x3(xa_ref, wa_ref, r0, th, wd, acc)
    acc = _accum_conv3x3(xb_ref, wb_ref, r0, th, wd, acc)
    y = jnp.maximum(acc + bias_ref[0], 0.0)
    o_ref[0] = y.astype(o_ref.dtype)


def _conv3x3_proj_kernel(x_ref, w_ref, bias_ref, w2_ref, b2_ref, o_ref, *, th):
    """3x3 conv + BN + ReLU fused with the final 1x1 (Cout=1) projection.

    Fusing removes a standalone lane-sparse pallas_call and a full HBM
    round-trip of the (N, H, W, 256) activation.
    """
    r0 = pl.multiple_of(pl.program_id(1) * th, th)
    wd = o_ref.shape[2]
    cout = w_ref.shape[3]
    acc = jnp.zeros((th, wd, cout), jnp.float32)
    acc = _accum_conv3x3(x_ref, w_ref, r0, th, wd, acc)
    y = jnp.maximum(acc + bias_ref[0], 0.0)                              # (th, W, 256)
    proj = jnp.dot(y, w2_ref[...], preferred_element_type=jnp.float32)   # (th, W, 1)
    o_ref[0] = (proj[..., 0] + b2_ref[0, 0]).astype(o_ref.dtype)


# ---------------------------------------------------------------------------
# Pallas wrappers
# ---------------------------------------------------------------------------
def conv1x1_bn_relu(x_nhwc, w, scale, bias, *, relu=True, tm=512,
                    out_dtype=jnp.float32):
    """1x1 conv + folded BN (+ReLU) as a (N*H*W, Cin) x (Cin, Cout) matmul."""
    n, h, wdt, cin = x_nhwc.shape
    cout = w.shape[1]
    m = n * h * wdt
    tm = min(tm, _round_up(m, 8))
    m_pad = _round_up(m, tm)

    wf = (w.astype(jnp.float32) * scale[None, :]).astype(_COMPUTE_DTYPE)
    bias2 = bias.reshape(1, cout).astype(jnp.float32)
    x2 = x_nhwc.reshape(m, cin).astype(_COMPUTE_DTYPE)
    if m_pad != m:
        x2 = jnp.pad(x2, ((0, m_pad - m), (0, 0)))

    out = pl.pallas_call(
        functools.partial(_matmul_bias_kernel, relu=relu),
        out_shape=jax.ShapeDtypeStruct((m_pad, cout), out_dtype),
        grid=(m_pad // tm,),
        in_specs=[
            pl.BlockSpec((tm, cin), lambda i: (i, 0)),
            pl.BlockSpec((cin, cout), lambda i: (0, 0)),
            pl.BlockSpec((1, cout), lambda i: (0, 0)),
        ],
        out_specs=pl.BlockSpec((tm, cout), lambda i: (i, 0)),
        compiler_params=pltpu.CompilerParams(
            dimension_semantics=("parallel",)),
    )(x2, wf, bias2)
    return out[:m].reshape(n, h, wdt, cout)


def conv3x3_dual_bn_relu(xa, xb, wa, wb, scale, bias, *, out_dtype=jnp.float32):
    """3x3 conv (pad=1) of cat([xa, xb], C) done as two Cin-split accumulations."""
    n, h, wd, ca = xa.shape
    cb = xb.shape[3]
    cout = wa.shape[3]
    th = _pick_row_tile(h)

    waf = (wa.astype(jnp.float32) * scale).astype(_COMPUTE_DTYPE)
    wbf = (wb.astype(jnp.float32) * scale).astype(_COMPUTE_DTYPE)
    bias2 = bias.reshape(1, cout).astype(jnp.float32)
    xap = jnp.pad(xa.astype(_COMPUTE_DTYPE), ((0, 0), (1, 1), (1, 1), (0, 0)))
    xbp = jnp.pad(xb.astype(_COMPUTE_DTYPE), ((0, 0), (1, 1), (1, 1), (0, 0)))

    # TODO(synk): at large H*W the whole padded image per batch element may not
    # fit v7x's 64 MiB VMEM; switch the input to memory_space=pl.ANY + manual
    # halo row-tile DMA in that regime.
    return pl.pallas_call(
        functools.partial(_conv3x3_dual_kernel, th=th),
        out_shape=jax.ShapeDtypeStruct((n, h, wd, cout), out_dtype),
        grid=(n, h // th),
        in_specs=[
            pl.BlockSpec((1, h + 2, wd + 2, ca), lambda b, r: (b, 0, 0, 0)),
            pl.BlockSpec((1, h + 2, wd + 2, cb), lambda b, r: (b, 0, 0, 0)),
            pl.BlockSpec((3, 3, ca, cout), lambda b, r: (0, 0, 0, 0)),
            pl.BlockSpec((3, 3, cb, cout), lambda b, r: (0, 0, 0, 0)),
            pl.BlockSpec((1, cout), lambda b, r: (0, 0)),
        ],
        out_specs=pl.BlockSpec((1, th, wd, cout), lambda b, r: (b, r, 0, 0)),
        compiler_params=pltpu.CompilerParams(
            dimension_semantics=("parallel", "parallel")),
    )(xap, xbp, waf, wbf, bias2)


def conv3x3_bn_relu_proj(x, w, scale, bias, w2, b2):
    """3x3 conv + folded BN + ReLU, fused with the final 1x1 (Cin -> 1) conv."""
    n, h, wd, cin = x.shape
    cout = w.shape[3]
    th = _pick_row_tile(h)

    wf = (w.astype(jnp.float32) * scale).astype(_COMPUTE_DTYPE)
    bias2 = bias.reshape(1, cout).astype(jnp.float32)
    w2f = w2.astype(jnp.float32)
    b2f = b2.reshape(1, 1).astype(jnp.float32)
    xp = jnp.pad(x.astype(_COMPUTE_DTYPE), ((0, 0), (1, 1), (1, 1), (0, 0)))

    return pl.pallas_call(
        functools.partial(_conv3x3_proj_kernel, th=th),
        out_shape=jax.ShapeDtypeStruct((n, h, wd), jnp.float32),
        grid=(n, h // th),
        in_specs=[
            pl.BlockSpec((1, h + 2, wd + 2, cin), lambda b, r: (b, 0, 0, 0)),
            pl.BlockSpec((3, 3, cin, cout), lambda b, r: (0, 0, 0, 0)),
            pl.BlockSpec((1, cout), lambda b, r: (0, 0)),
            pl.BlockSpec((cin, 1), lambda b, r: (0, 0)),
            pl.BlockSpec((1, 1), lambda b, r: (0, 0)),
        ],
        out_specs=pl.BlockSpec((1, th, wd), lambda b, r: (b, r, 0)),
        compiler_params=pltpu.CompilerParams(
            dimension_semantics=("parallel", "parallel")),
    )(xp, wf, bias2, w2f, b2f)


# ---------------------------------------------------------------------------
# Bilinear resize (glue, matches F.interpolate(mode='bilinear',
# align_corners=False)).  Gather-heavy resampling is kept in plain JAX.
# ---------------------------------------------------------------------------
def _resize_coords(out_size, in_size):
    i = jnp.arange(out_size, dtype=jnp.float32)
    src = (i + 0.5) * (in_size / out_size) - 0.5
    src = jnp.clip(src, 0.0, in_size - 1.0)
    i0 = jnp.floor(src).astype(jnp.int32)
    i1 = jnp.minimum(i0 + 1, in_size - 1)
    frac = src - i0.astype(jnp.float32)
    return i0, i1, frac


def bilinear_resize_nhwc(x, out_h, out_w):
    n, in_h, in_w, c = x.shape
    h0, h1, fh = _resize_coords(out_h, in_h)
    w0, w1, fw = _resize_coords(out_w, in_w)
    xh = (x[:, h0] * (1.0 - fh)[None, :, None, None]
          + x[:, h1] * fh[None, :, None, None])
    out = (xh[:, :, w0] * (1.0 - fw)[None, None, :, None]
           + xh[:, :, w1] * fw[None, None, :, None])
    return out


# ---------------------------------------------------------------------------
# Deterministic parameter init (synthetic; BN folded in eval mode)
# ---------------------------------------------------------------------------
def _fold_bn(key, cout, conv_bias=None):
    k1, k2, k3, k4 = jax.random.split(key, 4)
    gamma = 1.0 + 0.1 * jax.random.normal(k1, (cout,), jnp.float32)
    beta = 0.1 * jax.random.normal(k2, (cout,), jnp.float32)
    rmean = 0.1 * jax.random.normal(k3, (cout,), jnp.float32)
    rvar = 1.0 + 0.1 * jnp.abs(jax.random.normal(k4, (cout,), jnp.float32))
    scale = gamma / jnp.sqrt(rvar + _BN_EPS)
    bias = beta - rmean * scale
    if conv_bias is not None:
        bias = bias + conv_bias * scale
    return scale, bias


def _init_conv1x1_bn(key, cin, cout):
    kw, kb, kbn = jax.random.split(key, 3)
    w = jax.random.normal(kw, (cin, cout), jnp.float32) / jnp.sqrt(cin)
    b = 0.1 * jax.random.normal(kb, (cout,), jnp.float32)
    scale, bias = _fold_bn(kbn, cout, conv_bias=b)
    return w, scale, bias


def _init_conv3x3_bn(key, cin, cout):
    kw, kbn = jax.random.split(key, 2)
    w = jax.random.normal(kw, (3, 3, cin, cout), jnp.float32) / jnp.sqrt(9.0 * cin)
    scale, bias = _fold_bn(kbn, cout)          # ConvBNR conv has bias=False
    return w, scale, bias


def _init_final_conv(key, cin, cout):
    kw, kb = jax.random.split(key, 2)
    w = jax.random.normal(kw, (cin, cout), jnp.float32) / jnp.sqrt(cin)
    b = 0.1 * jax.random.normal(kb, (cout,), jnp.float32)
    return w, b                                 # no BN on the final 1x1 conv


def init_eam_params(key):
    keys = jax.random.split(key, 5)
    return {
        "reduce1": _init_conv1x1_bn(keys[0], 64, 64),
        "reduce4": _init_conv1x1_bn(keys[1], 512, 256),
        "block0": _init_conv3x3_bn(keys[2], 256 + 64, 256),
        "block1": _init_conv3x3_bn(keys[3], 256, 256),
        "block2": _init_final_conv(keys[4], 256, 1),
    }


# ---------------------------------------------------------------------------
# EAM forward (inputs/outputs NCHW like the PyTorch module)
# ---------------------------------------------------------------------------
def eam_forward(params, x4_nchw, x1_nchw):
    x1 = jnp.transpose(x1_nchw, (0, 2, 3, 1))   # -> NHWC
    x4 = jnp.transpose(x4_nchw, (0, 2, 3, 1))
    out_h, out_w = x1.shape[1], x1.shape[2]

    x1r = conv1x1_bn_relu(x1, *params["reduce1"], relu=True,
                          out_dtype=_COMPUTE_DTYPE)
    x4r = conv1x1_bn_relu(x4, *params["reduce4"], relu=True,
                          out_dtype=jnp.float32)
    x4u = bilinear_resize_nhwc(x4r, out_h, out_w)

    # torch.cat((x4, x1), dim=1) is fused into the first 3x3 conv by splitting
    # the weights along Cin (first 256 channels <- x4u, last 64 <- x1r).
    w0, s0, b0 = params["block0"]
    wa, wb = w0[:, :, :256, :], w0[:, :, 256:, :]
    y0 = conv3x3_dual_bn_relu(x4u, x1r, wa, wb, s0, b0,
                              out_dtype=_COMPUTE_DTYPE)

    w1, s1, b1 = params["block1"]
    w2, b2 = params["block2"]
    out = conv3x3_bn_relu_proj(y0, w1, s1, b1, w2, b2)     # (N, H, W) f32
    return out[:, None, :, :]                              # -> (N, 1, H, W)


if __name__ == "__main__":
    key = jax.random.PRNGKey(0)
    kx1, kx4, kp = jax.random.split(key, 3)

    N, H, W = 2, 16, 16
    x1 = jax.random.normal(kx1, (N, 64, H, W), jnp.float32)
    x4 = jax.random.normal(kx4, (N, 512, H // 2, W // 2), jnp.float32)

    params = init_eam_params(kp)
    out = eam_forward(params, x4, x1)
    out = jax.block_until_ready(out)

    assert out.shape == (N, 1, H, W), out.shape
    assert jnp.all(jnp.isfinite(out))
    print("KERNEL_OK")
</pallas_src>

<mosaic_0001>
module attributes {stable_mosaic.version = 11 : i64} {
  func.func @_matmul_bias_kernel(%arg0: i32, %arg1: memref<512x64xbf16, #tpu.memory_space<vmem>>, %arg2: memref<64x64xbf16, #tpu.memory_space<vmem>>, %arg3: memref<1x64xf32, #tpu.memory_space<vmem>>, %arg4: memref<512x64xbf16, #tpu.memory_space<vmem>>) attributes {dimension_semantics = [#tpu.dimension_semantics<parallel>], iteration_bounds = array<i64: 1>, scalar_prefetch = 0 : i64, scratch_operands = 0 : i64, tpu.core_type = #tpu.core_type<tc>, window_params = [{transform_indices = @transform_0, window_bounds = array<i64: 512, 64>}, {pipeline_mode = #tpu.pipeline_mode<synchronous>, transform_indices = @transform_1, window_bounds = array<i64: 64, 64>}, {pipeline_mode = #tpu.pipeline_mode<synchronous>, transform_indices = @transform_2, window_bounds = array<i64: 1, 64>}, {transform_indices = @transform_3, window_bounds = array<i64: 512, 64>}]} {
    %c0 = arith.constant 0 : index
    %c0_0 = arith.constant 0 : index
    %0 = vector.load %arg1[%c0, %c0_0] : memref<512x64xbf16, #tpu.memory_space<vmem>>, vector<512x64xbf16>
    %c0_1 = arith.constant 0 : index
    %c0_2 = arith.constant 0 : index
    %1 = vector.load %arg2[%c0_1, %c0_2] : memref<64x64xbf16, #tpu.memory_space<vmem>>, vector<64x64xbf16>
    %cst = arith.constant dense<0.000000e+00> : vector<512x64xf32>
    %2 = tpu.matmul %0, %1, %cst {dimension_numbers = #tpu.dot_dimension_numbers<[1], [0], [0], [1], [0, 0, 1, 1], [], []>} : vector<512x64xbf16>, vector<64x64xbf16>, vector<512x64xf32> -> vector<512x64xf32>
    %c0_3 = arith.constant 0 : index
    %c0_4 = arith.constant 0 : index
    %3 = vector.load %arg3[%c0_3, %c0_4] : memref<1x64xf32, #tpu.memory_space<vmem>>, vector<1x64xf32>
    %4 = vector.broadcast %3 : vector<1x64xf32> to vector<512x64xf32>
    %5 = arith.addf %2, %4 : vector<512x64xf32>
    %cst_5 = arith.constant 0.000000e+00 : f32
    %6 = vector.broadcast %cst_5 : f32 to vector<512x64xf32>
    %7 = arith.maximumf %5, %6 : vector<512x64xf32>
    %8 = arith.truncf %7 : vector<512x64xf32> to vector<512x64xbf16>
    %c0_6 = arith.constant 0 : index
    %c0_7 = arith.constant 0 : index
    %9 = vector.load %arg4[%c0_6, %c0_7] : memref<512x64xbf16, #tpu.memory_space<vmem>>, vector<512x64xbf16>
    tpu.vector_store %arg4[%c0_6, %c0_7], %8 {strides = array<i32>} : memref<512x64xbf16, #tpu.memory_space<vmem>>, vector<512x64xbf16>,
    return
  }
  func.func @transform_0(%arg0: i32) -> (i32, i32) {
    %c0_i32 = arith.constant 0 : i32
    %c0_i32_0 = arith.constant 0 : i32
    return %arg0, %c0_i32 : i32, i32
  }
  func.func @transform_1(%arg0: i32) -> (i32, i32) {
    %c0_i32 = arith.constant 0 : i32
    %c0_i32_0 = arith.constant 0 : i32
    %c0_i32_1 = arith.constant 0 : i32
    return %c0_i32, %c0_i32_0 : i32, i32
  }
  func.func @transform_2(%arg0: i32) -> (i32, i32) {
    %c0_i32 = arith.constant 0 : i32
    %c0_i32_0 = arith.constant 0 : i32
    %c0_i32_1 = arith.constant 0 : i32
    return %c0_i32, %c0_i32_0 : i32, i32
  }
  func.func @transform_3(%arg0: i32) -> (i32, i32) {
    %c0_i32 = arith.constant 0 : i32
    %c0_i32_0 = arith.constant 0 : i32
    return %arg0, %c0_i32 : i32, i32
  }
}

</mosaic_0001>

<bundles_post_ra>
// kernel: tpu_custom_call.1
= control target key start
LH: loop header
LB: loop body
LE: loop exit
PB: predicated region body
PF: predicated region fallthrough
CT: control target
= control target key end

     0   :  { %vm278_vm0 = vcmask 523264   ;;  %vm984_vm1 = vcmask 519168   ;;  %s1887_s1 = inlined_call_operand.vmem [shape: bf16[64,64], index: 1, kind: input, shape index: {}]   ;;  %s1888_s0 = inlined_call_operand.vmem [shape: bf16[512,64], index: 0, kind: input, shape index: {}]   ;;  %s1889_s2 = inlined_call_operand.vmem [shape: f32[1,64], index: 2, kind: input, shape index: {}]   ;;  %s1890_s3 = inlined_call_operand.vmem [shape: bf16[512,64], index: 3, kind: output, shape index: {}]  }
   0x1   :  { %v1366_v0 = vld [vmem:[%s1887_s1 + $0x18] sm:$0xff]   ;;  %v1367_v1 = vld [vmem:[%s1887_s1 + $0x10] sm:$0xff]   ;;  %v1368_v2 = vld [vmem:[%s1887_s1 + $0x8] sm:$0xff]  }
   0x2   :  { %1286 = vmatprep.subr.bf16.mxu0 %v1366_v0  ;;  %1358 = vmatprep.subr.bf16.mxu1 %v1366_v0  ;;  %v1370_v3 = vld [vmem:[%s1888_s0] sm:$0xff]   ;;  %v1372_v6 = vld [vmem:[%s1888_s0 + $0x8] sm:$0xff]   ;;  %v1374_v8 = vld [vmem:[%s1888_s0 + $0x10] sm:$0xff]  }
   0x3   :  { %1287 = vmatpush3.bf16.msra.mxu0 %v1366_v0  ;;  %1362 = vmatpush3.bf16.msra.mxu1 %v1366_v0  ;;  %v1371_v4 = vld [vmem:[%s1888_s0 + $0x80] sm:$0xff]   ;;  %v1373_v7 = vld [vmem:[%s1888_s0 + $0x88] sm:$0xff]   ;;  %v1375_v9 = vld [vmem:[%s1888_s0 + $0x90] sm:$0xff]  }
   0x4   :  { %1288 = vmatprep.subr.bf16.mxu0 %v1367_v1  ;;  %1359 = vmatprep.subr.bf16.mxu1 %v1367_v1  ;;  %v1369_v5 = vld [vmem:[%s1887_s1] sm:$0xff]   ;;  %v1376_v10 = vld [vmem:[%s1888_s0 + $0x18] sm:$0xff]   ;;  %v1380_v14 = vld [vmem:[%s1888_s0 + $0x28] sm:$0xff]  }
   0x5   :  { %1294 = vmatprep.mubr.msk.bf16.mxu0 %vm278_vm0, %v1370_v3  ;;  %1326 = vmatprep.mubr.msk.bf16.mxu1 %vm278_vm0, %v1371_v4  ;;  %v1377_v11 = vld [vmem:[%s1888_s0 + $0x98] sm:$0xff]   ;;  %v1378_v12 = vld [vmem:[%s1888_s0 + $0x20] sm:$0xff]   ;;  %v1381_v15 = vld [vmem:[%s1888_s0 + $0xa8] sm:$0xff]  }
   0x6   :  { %v1379_v13 = vld [vmem:[%s1888_s0 + $0xa0] sm:$0xff]   ;;  %v1382_v16 = vld [vmem:[%s1888_s0 + $0x30] sm:$0xff]   ;;  %v1384_v18 = vld [vmem:[%s1888_s0 + $0x38] sm:$0xff]  }
   0x7   :  { %1289 = vmatpush3.bf16.msra.mxu0 %v1367_v1  ;;  %1363 = vmatpush3.bf16.msra.mxu1 %v1367_v1  ;;  %v1383_v17 = vld [vmem:[%s1888_s0 + $0xb0] sm:$0xff]   ;;  %v1385_v19 = vld [vmem:[%s1888_s0 + $0xb8] sm:$0xff]   ;;  %v1386_v20 = vld [vmem:[%s1888_s0 + $0x40] sm:$0xff]  }
   0x8   :  { %1290 = vmatprep.subr.bf16.mxu0 %v1368_v2  ;;  %1360 = vmatprep.subr.bf16.mxu1 %v1368_v2  ;;  %v1387_v21 = vld [vmem:[%s1888_s0 + $0xc0] sm:$0xff]   ;;  %v1388_v22 = vld [vmem:[%s1888_s0 + $0x48] sm:$0xff]   ;;  %v1390_v24 = vld [vmem:[%s1888_s0 + $0x50] sm:$0xff]  }
   0x9   :  { %v1389_v23 = vld [vmem:[%s1888_s0 + $0xc8] sm:$0xff]   ;;  %v1391_v25 = vld [vmem:[%s1888_s0 + $0xd0] sm:$0xff]   ;;  %v1392_v26 = vld [vmem:[%s1888_s0 + $0x58] sm:$0xff]  }
   0xa   :  { %v1393_v27 = vld [vmem:[%s1888_s0 + $0xd8] sm:$0xff]   ;;  %v1394_v28 = vld [vmem:[%s1888_s0 + $0x60] sm:$0xff]   ;;  %v1396_v30 = vld [vmem:[%s1888_s0 + $0x68] sm:$0xff]  }
   0xb   :  { %1291 = vmatpush3.bf16.msra.mxu0 %v1368_v2  ;;  %1364 = vmatpush3.bf16.msra.mxu1 %v1368_v2  ;;  %v1395_v29 = vld [vmem:[%s1888_s0 + $0xe0] sm:$0xff]   ;;  %v1397_v31 = vld [vmem:[%s1888_s0 + $0xe8] sm:$0xff]   ;;  %v1398_v32 = vld [vmem:[%s1888_s0 + $0x70] sm:$0xff]  }
   0xc   :  { %1292 = vmatprep.subr.bf16.mxu0 %v1369_v5  ;;  %1361 = vmatprep.subr.bf16.mxu1 %v1369_v5  ;;  %v1399_v33 = vld [vmem:[%s1888_s0 + $0xf0] sm:$0xff]   ;;  %v1400_v34 = vld [vmem:[%s1888_s0 + $0x78] sm:$0xff]   ;;  %v1565_v36 = vld [vmem:[%s1889_s2] ss:$0 sm:$0xff] }
   0xd   :  { %v1401_v35 = vld [vmem:[%s1888_s0 + $0xf8] sm:$0xff]  }
   0xf   :  { %1293 = vmatpush3.bf16.msra.mxu0 %v1369_v5  ;;  %1365 = vmatpush3.bf16.msra.mxu1 %v1369_v5 }
  0x12   :  { %1295 = vmatmul.mubr.msk.bf16.vlgmr.msra.gmra.mxu0 %vm278_vm0, %v1372_v6  ;;  %1327 = vmatmul.mubr.msk.bf16.vlgmr.msra.gmra.mxu1 %vm278_vm0, %v1373_v7 }
  0x13   :  { %1298 = vmatprep.mubr.msk.bf16.mxu0 %vm278_vm0, %v1374_v8  ;;  %1330 = vmatprep.mubr.msk.bf16.mxu1 %vm278_vm0, %v1375_v9 }
  0x1a   :  { %1299 = vmatmul.mubr.msk.bf16.gmra.mxu0 %vm278_vm0, %v1376_v10  ;;  %1331 = vmatmul.mubr.msk.bf16.gmra.mxu1 %vm278_vm0, %v1377_v11 }
  0x1b   :  { %1302 = vmatprep.mubr.msk.bf16.mxu0 %vm278_vm0, %v1378_v12  ;;  %1334 = vmatprep.mubr.msk.bf16.mxu1 %vm278_vm0, %v1379_v13 }
  0x22   :  { %1303 = vmatmul.mubr.msk.bf16.gmra.mxu0 %vm278_vm0, %v1380_v14  ;;  %1335 = vmatmul.mubr.msk.bf16.gmra.mxu1 %vm278_vm0, %v1381_v15 }
  0x23   :  { %1306 = vmatprep.mubr.msk.bf16.mxu0 %vm278_vm0, %v1382_v16  ;;  %1338 = vmatprep.mubr.msk.bf16.mxu1 %vm278_vm0, %v1383_v17 }
  0x2a   :  { %1307 = vmatmul.mubr.msk.bf16.gmra.mxu0 %vm278_vm0, %v1384_v18  ;;  %1339 = vmatmul.mubr.msk.bf16.gmra.mxu1 %vm278_vm0, %v1385_v19 }
  0x2b   :  { %1310 = vmatprep.mubr.msk.bf16.mxu0 %vm278_vm0, %v1386_v20  ;;  %1342 = vmatprep.mubr.msk.bf16.mxu1 %vm278_vm0, %v1387_v21 }
  0x32   :  { %1311 = vmatmul.mubr.msk.bf16.gmra.mxu0 %vm278_vm0, %v1388_v22  ;;  %1343 = vmatmul.mubr.msk.bf16.gmra.mxu1 %vm278_vm0, %v1389_v23 }
  0x33   :  { %1314 = vmatprep.mubr.msk.bf16.mxu0 %vm278_vm0, %v1390_v24  ;;  %1346 = vmatprep.mubr.msk.bf16.mxu1 %vm278_vm0, %v1391_v25 }
  0x3a   :  { %1315 = vmatmul.mubr.msk.bf16.gmra.mxu0 %vm278_vm0, %v1392_v26  ;;  %1347 = vmatmul.mubr.msk.bf16.gmra.mxu1 %vm278_vm0, %v1393_v27 }
  0x3b   :  { %1318 = vmatprep.mubr.msk.bf16.mxu0 %vm278_vm0, %v1394_v28  ;;  %1350 = vmatprep.mubr.msk.bf16.mxu1 %vm278_vm0, %v1395_v29 }
  0x42   :  { %1319 = vmatmul.mubr.msk.bf16.gmra.mxu0 %vm278_vm0, %v1396_v30  ;;  %1351 = vmatmul.mubr.msk.bf16.gmra.mxu1 %vm278_vm0, %v1397_v31 }
  0x43   :  { %1322 = vmatprep.mubr.msk.bf16.mxu0 %vm278_vm0, %v1398_v32  ;;  %1354 = vmatprep.mubr.msk.bf16.mxu1 %vm278_vm0, %v1399_v33 }
  0x4a   :  { %1323 = vmatmul.mubr.msk.bf16.gmra.mxu0 %vm278_vm0, %v1400_v34  ;;  %1355 = vmatmul.mubr.msk.bf16.gmra.mxu1 %vm278_vm0, %v1401_v35 }
  0xd2   :  { %v1296_v37 = vpop.f32.mrf.mxu0  ;;  %v1328_v38 = vpop.f32.mrf.mxu1 }
  0xd3   :  { %v418_v39 = vadd.f32 %v1296_v37, %v1565_v36  ;;  %v546_v40 = vadd.f32 %v1328_v38, %v1565_v36 }
  0xd4   :  { %v409_v41 = vpop.f32.mrf.mxu0  ;;  %v537_v42 = vpop.f32.mrf.mxu1 }
  0xd5   :  { %v666_v43 = vmax.f32 %v418_v39, 0.0  ;;  %v698_v44 = vmax.f32 %v546_v40, 0.0  ;;  %v410_v45 = vadd.f32 %v1565_v36, %v409_v41  ;;  %v538_v46 = vadd.f32 %v1565_v36, %v537_v42 }
  0xd6   :  { %v1297_v47 = vpop.f32.mrf.mxu0  ;;  %v1329_v48 = vpop.f32.mrf.mxu1 }
  0xd7   :  { %v1188_v49 = vpack.c.bf16 %v666_v43, %v666_v43  ;;  %v1220_v50 = vpack.c.bf16 %v698_v44, %v698_v44  ;;  %v664_v51 = vmax.f32 %v410_v45, 0.0  ;;  %v696_v52 = vmax.f32 %v538_v46, 0.0 }
  0xd8   :  { %v421_v53 = vadd.f32 %v1297_v47, %v1565_v36  ;;  %v549_v54 = vadd.f32 %v1329_v48, %v1565_v36  ;;  %v412_v55 = vpop.f32.mrf.mxu0  ;;  %v540_v56 = vpop.f32.mrf.mxu1 }
  0xd9   :  { %987 = vst.msk [vmem:[%s1890_s3 + $0x8] sm:$0xf] %vm984_vm1, %v1188_v49  ;;  %1019 = vst.msk [vmem:[%s1890_s3 + $0x88] sm:$0xf] %vm984_vm1, %v1220_v50  ;;  %v1186_v57 = vpack.c.bf16 %v664_v51, %v664_v51  ;;  %v1218_v58 = vpack.c.bf16 %v696_v52, %v696_v52  ;;  %v413_v59 = vadd.f32 %v1565_v36, %v412_v55 }
  0xda   :  { %v541_v60 = vadd.f32 %v1565_v36, %v540_v56  ;;  %v667_v61 = vmax.f32 %v421_v53, 0.0  ;;  %v699_v62 = vmax.f32 %v549_v54, 0.0  ;;  %v1300_v63 = vpop.f32.mrf.mxu0  ;;  %v1332_v0 = vpop.f32.mrf.mxu1 }
  0xdb   :  { %985 = vst.msk [vmem:[%s1890_s3] sm:$0xf] %vm984_vm1, %v1186_v57  ;;  %1017 = vst.msk [vmem:[%s1890_s3 + $0x80] sm:$0xf] %vm984_vm1, %v1218_v58  ;;  %v665_v1 = vmax.f32 %v413_v59, 0.0  ;;  %v434_v3 = vadd.f32 %v1300_v63, %v1565_v36  ;;  %v562_v4 = vadd.f32 %v1332_v0, %v1565_v36 }
  0xdc   :  { %v697_v2 = vmax.f32 %v541_v60, 0.0  ;;  %v1189_v5 = vpack.c.bf16 %v667_v61, %v667_v61  ;;  %v1221_v6 = vpack.c.bf16 %v699_v62, %v699_v62  ;;  %v425_v7 = vpop.f32.mrf.mxu0  ;;  %v553_v8 = vpop.f32.mrf.mxu1 }
  0xdd   :  { %v1187_v9 = vpack.c.bf16 %v665_v1, %v665_v1  ;;  %v670_v11 = vmax.f32 %v434_v3, 0.0  ;;  %v702_v12 = vmax.f32 %v562_v4, 0.0  ;;  %v426_v13 = vadd.f32 %v1565_v36, %v425_v7 }
  0xde   :  { %v1219_v10 = vpack.c.bf16 %v697_v2, %v697_v2  ;;  %988 = vst.msk [vmem:[%s1890_s3 + $0xc] sm:$0xf] %vm984_vm1, %v1189_v5  ;;  %1020 = vst.msk [vmem:[%s1890_s3 + $0x8c] sm:$0xf] %vm984_vm1, %v1221_v6  ;;  %v554_v14 = vadd.f32 %v1565_v36, %v553_v8  ;;  %v1301_v15 = vpop.f32.mrf.mxu0  ;;  %v1333_v16 = vpop.f32.mrf.mxu1 }
  0xdf   :  { %986 = vst.msk [vmem:[%s1890_s3 + $0x4] sm:$0xf] %vm984_vm1, %v1187_v9  ;;  %v1192_v17 = vpack.c.bf16 %v670_v11, %v670_v11  ;;  %v1224_v18 = vpack.c.bf16 %v702_v12, %v702_v12  ;;  %v437_v19 = vadd.f32 %v1301_v15, %v1565_v36  ;;  %v565_v20 = vadd.f32 %v1333_v16, %v1565_v36 }
  0xe0   :  { %1018 = vst.msk [vmem:[%s1890_s3 + $0x84] sm:$0xf] %vm984_vm1, %v1219_v10  ;;  %v668_v21 = vmax.f32 %v426_v13, 0.0  ;;  %v700_v22 = vmax.f32 %v554_v14, 0.0  ;;  %v428_v23 = vpop.f32.mrf.mxu0  ;;  %v556_v24 = vpop.f32.mrf.mxu1 }
  0xe1   :  { %991 = vst.msk [vmem:[%s1890_s3 + $0x18] sm:$0xf] %vm984_vm1, %v1192_v17  ;;  %1023 = vst.msk [vmem:[%s1890_s3 + $0x98] sm:$0xf] %vm984_vm1, %v1224_v18  ;;  %v671_v25 = vmax.f32 %v437_v19, 0.0  ;;  %v703_v26 = vmax.f32 %v565_v20, 0.0  ;;  %v429_v27 = vadd.f32 %v1565_v36, %v428_v23  ;;  %v557_v28 = vadd.f32 %v1565_v36, %v556_v24 }
  0xe2   :  { %v1190_v29 = vpack.c.bf16 %v668_v21, %v668_v21  ;;  %v1222_v30 = vpack.c.bf16 %v700_v22, %v700_v22  ;;  %v1304_v31 = vpop.f32.mrf.mxu0  ;;  %v1336_v32 = vpop.f32.mrf.mxu1 }
  0xe3   :  { %v1193_v33 = vpack.c.bf16 %v671_v25, %v671_v25  ;;  %v1225_v34 = vpack.c.bf16 %v703_v26, %v703_v26  ;;  %v669_v35 = vmax.f32 %v429_v27, 0.0  ;;  %v701_v37 = vmax.f32 %v557_v28, 0.0 }
  0xe4   :  { %989 = vst.msk [vmem:[%s1890_s3 + $0x10] sm:$0xf] %vm984_vm1, %v1190_v29  ;;  %1021 = vst.msk [vmem:[%s1890_s3 + $0x90] sm:$0xf] %vm984_vm1, %v1222_v30  ;;  %v450_v38 = vadd.f32 %v1304_v31, %v1565_v36  ;;  %v578_v39 = vadd.f32 %v1336_v32, %v1565_v36  ;;  %v441_v40 = vpop.f32.mrf.mxu0  ;;  %v569_v41 = vpop.f32.mrf.mxu1 }
  0xe5   :  { %992 = vst.msk [vmem:[%s1890_s3 + $0x1c] sm:$0xf] %vm984_vm1, %v1193_v33  ;;  %1024 = vst.msk [vmem:[%s1890_s3 + $0x9c] sm:$0xf] %vm984_vm1, %v1225_v34  ;;  %v1191_v42 = vpack.c.bf16 %v669_v35, %v669_v35  ;;  %v1223_v43 = vpack.c.bf16 %v701_v37, %v701_v37  ;;  %v442_v44 = vadd.f32 %v1565_v36, %v441_v40 }
  0xe6   :  { %v570_v45 = vadd.f32 %v1565_v36, %v569_v41  ;;  %v674_v46 = vmax.f32 %v450_v38, 0.0  ;;  %v706_v47 = vmax.f32 %v578_v39, 0.0  ;;  %v1305_v48 = vpop.f32.mrf.mxu0  ;;  %v1337_v49 = vpop.f32.mrf.mxu1 }
  0xe7   :  { %990 = vst.msk [vmem:[%s1890_s3 + $0x14] sm:$0xf] %vm984_vm1, %v1191_v42  ;;  %1022 = vst.msk [vmem:[%s1890_s3 + $0x94] sm:$0xf] %vm984_vm1, %v1223_v43  ;;  %v672_v50 = vmax.f32 %v442_v44, 0.0  ;;  %v453_v52 = vadd.f32 %v1305_v48, %v1565_v36  ;;  %v581_v53 = vadd.f32 %v1337_v49, %v1565_v36 }
  0xe8   :  { %v704_v51 = vmax.f32 %v570_v45, 0.0  ;;  %v1196_v54 = vpack.c.bf16 %v674_v46, %v674_v46  ;;  %v1228_v55 = vpack.c.bf16 %v706_v47, %v706_v47  ;;  %v444_v56 = vpop.f32.mrf.mxu0  ;;  %v572_v57 = vpop.f32.mrf.mxu1 }
  0xe9   :  { %v1194_v58 = vpack.c.bf16 %v672_v50, %v672_v50  ;;  %v675_v60 = vmax.f32 %v453_v52, 0.0  ;;  %v707_v61 = vmax.f32 %v581_v53, 0.0  ;;  %v445_v62 = vadd.f32 %v1565_v36, %v444_v56 }
  0xea   :  { %v1226_v59 = vpack.c.bf16 %v704_v51, %v704_v51  ;;  %995 = vst.msk [vmem:[%s1890_s3 + $0x28] sm:$0xf] %vm984_vm1, %v1196_v54  ;;  %1027 = vst.msk [vmem:[%s1890_s3 + $0xa8] sm:$0xf] %vm984_vm1, %v1228_v55  ;;  %v573_v63 = vadd.f32 %v1565_v36, %v572_v57  ;;  %v1308_v0 = vpop.f32.mrf.mxu0  ;;  %v1340_v1 = vpop.f32.mrf.mxu1 }
  0xeb   :  { %993 = vst.msk [vmem:[%s1890_s3 + $0x20] sm:$0xf] %vm984_vm1, %v1194_v58  ;;  %v1197_v2 = vpack.c.bf16 %v675_v60, %v675_v60  ;;  %v1229_v3 = vpack.c.bf16 %v707_v61, %v707_v61  ;;  %v466_v4 = vadd.f32 %v1308_v0, %v1565_v36  ;;  %v594_v5 = vadd.f32 %v1340_v1, %v1565_v36 }
  0xec   :  { %1025 = vst.msk [vmem:[%s1890_s3 + $0xa0] sm:$0xf] %vm984_vm1, %v1226_v59  ;;  %v673_v6 = vmax.f32 %v445_v62, 0.0  ;;  %v705_v7 = vmax.f32 %v573_v63, 0.0  ;;  %v457_v8 = vpop.f32.mrf.mxu0  ;;  %v585_v9 = vpop.f32.mrf.mxu1 }
  0xed   :  { %996 = vst.msk [vmem:[%s1890_s3 + $0x2c] sm:$0xf] %vm984_vm1, %v1197_v2  ;;  %1028 = vst.msk [vmem:[%s1890_s3 + $0xac] sm:$0xf] %vm984_vm1, %v1229_v3  ;;  %v678_v10 = vmax.f32 %v466_v4, 0.0  ;;  %v710_v11 = vmax.f32 %v594_v5, 0.0  ;;  %v458_v12 = vadd.f32 %v1565_v36, %v457_v8  ;;  %v586_v13 = vadd.f32 %v1565_v36, %v585_v9 }
  0xee   :  { %v1195_v14 = vpack.c.bf16 %v673_v6, %v673_v6  ;;  %v1227_v15 = vpack.c.bf16 %v705_v7, %v705_v7  ;;  %v1309_v16 = vpop.f32.mrf.mxu0  ;;  %v1341_v17 = vpop.f32.mrf.mxu1 }
  0xef   :  { %v1200_v18 = vpack.c.bf16 %v678_v10, %v678_v10  ;;  %v1232_v19 = vpack.c.bf16 %v710_v11, %v710_v11  ;;  %v676_v20 = vmax.f32 %v458_v12, 0.0  ;;  %v708_v21 = vmax.f32 %v586_v13, 0.0 }
  0xf0   :  { %994 = vst.msk [vmem:[%s1890_s3 + $0x24] sm:$0xf] %vm984_vm1, %v1195_v14  ;;  %1026 = vst.msk [vmem:[%s1890_s3 + $0xa4] sm:$0xf] %vm984_vm1, %v1227_v15  ;;  %v469_v22 = vadd.f32 %v1309_v16, %v1565_v36  ;;  %v597_v23 = vadd.f32 %v1341_v17, %v1565_v36  ;;  %v460_v24 = vpop.f32.mrf.mxu0  ;;  %v588_v25 = vpop.f32.mrf.mxu1 }
  0xf1   :  { %999 = vst.msk [vmem:[%s1890_s3 + $0x38] sm:$0xf] %vm984_vm1, %v1200_v18  ;;  %1031 = vst.msk [vmem:[%s1890_s3 + $0xb8] sm:$0xf] %vm984_vm1, %v1232_v19  ;;  %v1198_v26 = vpack.c.bf16 %v676_v20, %v676_v20  ;;  %v1230_v27 = vpack.c.bf16 %v708_v21, %v708_v21  ;;  %v461_v28 = vadd.f32 %v1565_v36, %v460_v24 }
  0xf2   :  { %v589_v29 = vadd.f32 %v1565_v36, %v588_v25  ;;  %v679_v30 = vmax.f32 %v469_v22, 0.0  ;;  %v711_v31 = vmax.f32 %v597_v23, 0.0  ;;  %v1312_v32 = vpop.f32.mrf.mxu0  ;;  %v1344_v33 = vpop.f32.mrf.mxu1 }
  0xf3   :  { %997 = vst.msk [vmem:[%s1890_s3 + $0x30] sm:$0xf] %vm984_vm1, %v1198_v26  ;;  %1029 = vst.msk [vmem:[%s1890_s3 + $0xb0] sm:$0xf] %vm984_vm1, %v1230_v27  ;;  %v677_v34 = vmax.f32 %v461_v28, 0.0  ;;  %v482_v37 = vadd.f32 %v1312_v32, %v1565_v36  ;;  %v610_v38 = vadd.f32 %v1344_v33, %v1565_v36 }
  0xf4   :  { %v709_v35 = vmax.f32 %v589_v29, 0.0  ;;  %v1201_v39 = vpack.c.bf16 %v679_v30, %v679_v30  ;;  %v1233_v40 = vpack.c.bf16 %v711_v31, %v711_v31  ;;  %v473_v41 = vpop.f32.mrf.mxu0  ;;  %v601_v42 = vpop.f32.mrf.mxu1 }
  0xf5   :  { %v1199_v43 = vpack.c.bf16 %v677_v34, %v677_v34  ;;  %v682_v45 = vmax.f32 %v482_v37, 0.0  ;;  %v714_v46 = vmax.f32 %v610_v38, 0.0  ;;  %v474_v47 = vadd.f32 %v1565_v36, %v473_v41 }
  0xf6   :  { %v1231_v44 = vpack.c.bf16 %v709_v35, %v709_v35  ;;  %1000 = vst.msk [vmem:[%s1890_s3 + $0x3c] sm:$0xf] %vm984_vm1, %v1201_v39  ;;  %1032 = vst.msk [vmem:[%s1890_s3 + $0xbc] sm:$0xf] %vm984_vm1, %v1233_v40  ;;  %v602_v48 = vadd.f32 %v1565_v36, %v601_v42  ;;  %v1313_v49 = vpop.f32.mrf.mxu0  ;;  %v1345_v50 = vpop.f32.mrf.mxu1 }
  0xf7   :  { %998 = vst.msk [vmem:[%s1890_s3 + $0x34] sm:$0xf] %vm984_vm1, %v1199_v43  ;;  %v1204_v51 = vpack.c.bf16 %v682_v45, %v682_v45  ;;  %v1236_v52 = vpack.c.bf16 %v714_v46, %v714_v46  ;;  %v485_v53 = vadd.f32 %v1313_v49, %v1565_v36  ;;  %v613_v54 = vadd.f32 %v1345_v50, %v1565_v36 }
  0xf8   :  { %1030 = vst.msk [vmem:[%s1890_s3 + $0xb4] sm:$0xf] %vm984_vm1, %v1231_v44  ;;  %v680_v55 = vmax.f32 %v474_v47, 0.0  ;;  %v712_v56 = vmax.f32 %v602_v48, 0.0  ;;  %v476_v57 = vpop.f32.mrf.mxu0  ;;  %v604_v58 = vpop.f32.mrf.mxu1 }
  0xf9   :  { %1003 = vst.msk [vmem:[%s1890_s3 + $0x48] sm:$0xf] %vm984_vm1, %v1204_v51  ;;  %1035 = vst.msk [vmem:[%s1890_s3 + $0xc8] sm:$0xf] %vm984_vm1, %v1236_v52  ;;  %v683_v59 = vmax.f32 %v485_v53, 0.0  ;;  %v715_v60 = vmax.f32 %v613_v54, 0.0  ;;  %v477_v61 = vadd.f32 %v1565_v36, %v476_v57  ;;  %v605_v62 = vadd.f32 %v1565_v36, %v604_v58 }
  0xfa   :  { %v1202_v63 = vpack.c.bf16 %v680_v55, %v680_v55  ;;  %v1234_v0 = vpack.c.bf16 %v712_v56, %v712_v56  ;;  %v1316_v1 = vpop.f32.mrf.mxu0  ;;  %v1348_v2 = vpop.f32.mrf.mxu1 }
  0xfb   :  { %v1205_v3 = vpack.c.bf16 %v683_v59, %v683_v59  ;;  %v1237_v4 = vpack.c.bf16 %v715_v60, %v715_v60  ;;  %v681_v5 = vmax.f32 %v477_v61, 0.0  ;;  %v713_v6 = vmax.f32 %v605_v62, 0.0 }
  0xfc   :  { %1001 = vst.msk [vmem:[%s1890_s3 + $0x40] sm:$0xf] %vm984_vm1, %v1202_v63  ;;  %1033 = vst.msk [vmem:[%s1890_s3 + $0xc0] sm:$0xf] %vm984_vm1, %v1234_v0  ;;  %v498_v7 = vadd.f32 %v1316_v1, %v1565_v36  ;;  %v626_v8 = vadd.f32 %v1348_v2, %v1565_v36  ;;  %v489_v9 = vpop.f32.mrf.mxu0  ;;  %v617_v10 = vpop.f32.mrf.mxu1 }
  0xfd   :  { %1004 = vst.msk [vmem:[%s1890_s3 + $0x4c] sm:$0xf] %vm984_vm1, %v1205_v3  ;;  %1036 = vst.msk [vmem:[%s1890_s3 + $0xcc] sm:$0xf] %vm984_vm1, %v1237_v4  ;;  %v1203_v11 = vpack.c.bf16 %v681_v5, %v681_v5  ;;  %v1235_v12 = vpack.c.bf16 %v713_v6, %v713_v6  ;;  %v490_v13 = vadd.f32 %v1565_v36, %v489_v9 }
  0xfe   :  { %v618_v14 = vadd.f32 %v1565_v36, %v617_v10  ;;  %v686_v15 = vmax.f32 %v498_v7, 0.0  ;;  %v718_v16 = vmax.f32 %v626_v8, 0.0  ;;  %v1317_v17 = vpop.f32.mrf.mxu0  ;;  %v1349_v18 = vpop.f32.mrf.mxu1 }
  0xff   :  { %1002 = vst.msk [vmem:[%s1890_s3 + $0x44] sm:$0xf] %vm984_vm1, %v1203_v11  ;;  %1034 = vst.msk [vmem:[%s1890_s3 + $0xc4] sm:$0xf] %vm984_vm1, %v1235_v12  ;;  %v684_v19 = vmax.f32 %v490_v13, 0.0  ;;  %v501_v21 = vadd.f32 %v1317_v17, %v1565_v36  ;;  %v629_v22 = vadd.f32 %v1349_v18, %v1565_v36 }
 0x100   :  { %v716_v20 = vmax.f32 %v618_v14, 0.0  ;;  %v1208_v23 = vpack.c.bf16 %v686_v15, %v686_v15  ;;  %v1240_v24 = vpack.c.bf16 %v718_v16, %v718_v16  ;;  %v492_v25 = vpop.f32.mrf.mxu0  ;;  %v620_v26 = vpop.f32.mrf.mxu1 }
 0x101   :  { %v1206_v27 = vpack.c.bf16 %v684_v19, %v684_v19  ;;  %v687_v29 = vmax.f32 %v501_v21, 0.0  ;;  %v719_v30 = vmax.f32 %v629_v22, 0.0  ;;  %v493_v31 = vadd.f32 %v1565_v36, %v492_v25 }
 0x102   :  { %v1238_v28 = vpack.c.bf16 %v716_v20, %v716_v20  ;;  %1007 = vst.msk [vmem:[%s1890_s3 + $0x58] sm:$0xf] %vm984_vm1, %v1208_v23  ;;  %1039 = vst.msk [vmem:[%s1890_s3 + $0xd8] sm:$0xf] %vm984_vm1, %v1240_v24  ;;  %v621_v32 = vadd.f32 %v1565_v36, %v620_v26  ;;  %v1320_v33 = vpop.f32.mrf.mxu0  ;;  %v1352_v34 = vpop.f32.mrf.mxu1 }
 0x103   :  { %1005 = vst.msk [vmem:[%s1890_s3 + $0x50] sm:$0xf] %vm984_vm1, %v1206_v27  ;;  %v1209_v35 = vpack.c.bf16 %v687_v29, %v687_v29  ;;  %v1241_v37 = vpack.c.bf16 %v719_v30, %v719_v30  ;;  %v514_v38 = vadd.f32 %v1320_v33, %v1565_v36  ;;  %v642_v39 = vadd.f32 %v1352_v34, %v1565_v36 }
 0x104   :  { %1037 = vst.msk [vmem:[%s1890_s3 + $0xd0] sm:$0xf] %vm984_vm1, %v1238_v28  ;;  %v685_v40 = vmax.f32 %v493_v31, 0.0  ;;  %v717_v41 = vmax.f32 %v621_v32, 0.0  ;;  %v505_v42 = vpop.f32.mrf.mxu0  ;;  %v633_v43 = vpop.f32.mrf.mxu1 }
 0x105   :  { %1008 = vst.msk [vmem:[%s1890_s3 + $0x5c] sm:$0xf] %vm984_vm1, %v1209_v35  ;;  %1040 = vst.msk [vmem:[%s1890_s3 + $0xdc] sm:$0xf] %vm984_vm1, %v1241_v37  ;;  %v690_v44 = vmax.f32 %v514_v38, 0.0  ;;  %v722_v45 = vmax.f32 %v642_v39, 0.0  ;;  %v506_v46 = vadd.f32 %v1565_v36, %v505_v42  ;;  %v634_v47 = vadd.f32 %v1565_v36, %v633_v43 }
 0x106   :  { %v1207_v48 = vpack.c.bf16 %v685_v40, %v685_v40  ;;  %v1239_v49 = vpack.c.bf16 %v717_v41, %v717_v41  ;;  %v1321_v50 = vpop.f32.mrf.mxu0  ;;  %v1353_v51 = vpop.f32.mrf.mxu1 }
 0x107   :  { %v1212_v52 = vpack.c.bf16 %v690_v44, %v690_v44  ;;  %v1244_v53 = vpack.c.bf16 %v722_v45, %v722_v45  ;;  %v688_v54 = vmax.f32 %v506_v46, 0.0  ;;  %v720_v55 = vmax.f32 %v634_v47, 0.0 }
 0x108   :  { %1006 = vst.msk [vmem:[%s1890_s3 + $0x54] sm:$0xf] %vm984_vm1, %v1207_v48  ;;  %1038 = vst.msk [vmem:[%s1890_s3 + $0xd4] sm:$0xf] %vm984_vm1, %v1239_v49  ;;  %v517_v56 = vadd.f32 %v1321_v50, %v1565_v36  ;;  %v645_v57 = vadd.f32 %v1353_v51, %v1565_v36  ;;  %v508_v58 = vpop.f32.mrf.mxu0  ;;  %v636_v59 = vpop.f32.mrf.mxu1 }
 0x109   :  { %1011 = vst.msk [vmem:[%s1890_s3 + $0x68] sm:$0xf] %vm984_vm1, %v1212_v52  ;;  %1043 = vst.msk [vmem:[%s1890_s3 + $0xe8] sm:$0xf] %vm984_vm1, %v1244_v53  ;;  %v1210_v60 = vpack.c.bf16 %v688_v54, %v688_v54  ;;  %v1242_v61 = vpack.c.bf16 %v720_v55, %v720_v55  ;;  %v509_v62 = vadd.f32 %v1565_v36, %v508_v58 }
 0x10a   :  { %v637_v63 = vadd.f32 %v1565_v36, %v636_v59  ;;  %v691_v0 = vmax.f32 %v517_v56, 0.0  ;;  %v723_v1 = vmax.f32 %v645_v57, 0.0  ;;  %v1324_v2 = vpop.f32.mrf.mxu0  ;;  %v1356_v3 = vpop.f32.mrf.mxu1 }
 0x10b   :  { %1009 = vst.msk [vmem:[%s1890_s3 + $0x60] sm:$0xf] %vm984_vm1, %v1210_v60  ;;  %1041 = vst.msk [vmem:[%s1890_s3 + $0xe0] sm:$0xf] %vm984_vm1, %v1242_v61  ;;  %v689_v4 = vmax.f32 %v509_v62, 0.0  ;;  %v530_v6 = vadd.f32 %v1324_v2, %v1565_v36  ;;  %v658_v7 = vadd.f32 %v1356_v3, %v1565_v36 }
 0x10c   :  { %v721_v5 = vmax.f32 %v637_v63, 0.0  ;;  %v1213_v8 = vpack.c.bf16 %v691_v0, %v691_v0  ;;  %v1245_v9 = vpack.c.bf16 %v723_v1, %v723_v1  ;;  %v521_v10 = vpop.f32.mrf.mxu0  ;;  %v649_v11 = vpop.f32.mrf.mxu1 }
 0x10d   :  { %v1211_v12 = vpack.c.bf16 %v689_v4, %v689_v4  ;;  %v694_v14 = vmax.f32 %v530_v6, 0.0  ;;  %v726_v15 = vmax.f32 %v658_v7, 0.0  ;;  %v522_v16 = vadd.f32 %v1565_v36, %v521_v10 }
 0x10e   :  { %v1243_v13 = vpack.c.bf16 %v721_v5, %v721_v5  ;;  %1012 = vst.msk [vmem:[%s1890_s3 + $0x6c] sm:$0xf] %vm984_vm1, %v1213_v8  ;;  %1044 = vst.msk [vmem:[%s1890_s3 + $0xec] sm:$0xf] %vm984_vm1, %v1245_v9  ;;  %v650_v17 = vadd.f32 %v1565_v36, %v649_v11  ;;  %v1325_v18 = vpop.f32.mrf.mxu0  ;;  %v1357_v19 = vpop.f32.mrf.mxu1 }
 0x10f   :  { %1010 = vst.msk [vmem:[%s1890_s3 + $0x64] sm:$0xf] %vm984_vm1, %v1211_v12  ;;  %v1216_v20 = vpack.c.bf16 %v694_v14, %v694_v14  ;;  %v1248_v21 = vpack.c.bf16 %v726_v15, %v726_v15  ;;  %v533_v22 = vadd.f32 %v1325_v18, %v1565_v36  ;;  %v661_v23 = vadd.f32 %v1357_v19, %v1565_v36 }
 0x110   :  { %1042 = vst.msk [vmem:[%s1890_s3 + $0xe4] sm:$0xf] %vm984_vm1, %v1243_v13  ;;  %v692_v24 = vmax.f32 %v522_v16, 0.0  ;;  %v724_v25 = vmax.f32 %v650_v17, 0.0  ;;  %v524_v26 = vpop.f32.mrf.mxu0  ;;  %v652_v27 = vpop.f32.mrf.mxu1 }
 0x111   :  { %1015 = vst.msk [vmem:[%s1890_s3 + $0x78] sm:$0xf] %vm984_vm1, %v1216_v20  ;;  %1047 = vst.msk [vmem:[%s1890_s3 + $0xf8] sm:$0xf] %vm984_vm1, %v1248_v21  ;;  %v695_v28 = vmax.f32 %v533_v22, 0.0  ;;  %v727_v29 = vmax.f32 %v661_v23, 0.0  ;;  %v525_v30 = vadd.f32 %v1565_v36, %v524_v26  ;;  %v653_v31 = vadd.f32 %v1565_v36, %v652_v27 }
 0x112   :  { %v1214_v32 = vpack.c.bf16 %v692_v24, %v692_v24  ;;  %v1246_v33 = vpack.c.bf16 %v724_v25, %v724_v25 }
 0x113   :  { %v1217_v34 = vpack.c.bf16 %v695_v28, %v695_v28  ;;  %v1249_v35 = vpack.c.bf16 %v727_v29, %v727_v29  ;;  %v693_v37 = vmax.f32 %v525_v30, 0.0  ;;  %v725_v38 = vmax.f32 %v653_v31, 0.0 }
 0x114   :  { %1013 = vst.msk [vmem:[%s1890_s3 + $0x70] sm:$0xf] %vm984_vm1, %v1214_v32  ;;  %1045 = vst.msk [vmem:[%s1890_s3 + $0xf0] sm:$0xf] %vm984_vm1, %v1246_v33 }
 0x115   :  { %1016 = vst.msk [vmem:[%s1890_s3 + $0x7c] sm:$0xf] %vm984_vm1, %v1217_v34  ;;  %1048 = vst.msk [vmem:[%s1890_s3 + $0xfc] sm:$0xf] %vm984_vm1, %v1249_v35  ;;  %v1215_v36 = vpack.c.bf16 %v693_v37, %v693_v37  ;;  %v1247_v39 = vpack.c.bf16 %v725_v38, %v725_v38 }
 0x117   :  { %1014 = vst.msk [vmem:[%s1890_s3 + $0x74] sm:$0xf] %vm984_vm1, %v1215_v36  ;;  %1046 = vst.msk [vmem:[%s1890_s3 + $0xf4] sm:$0xf] %vm984_vm1, %v1247_v39 }

</bundles_post_ra>
